<compile_context>
chip_gen: v6e
topology: v6e:2x2x1
jax: 0.10.0
libtpu: 0.0.40
codegen_flags: <defaults>
</compile_context>

<pallas_src>
import functools

import jax
import jax.numpy as jnp
from jax.experimental import pallas as pl
from jax.experimental.pallas import tpu as pltpu

_BF16 = jnp.bfloat16

_COMPILER_PARAMS = pltpu.CompilerParams(
    dimension_semantics=("parallel",),
    vmem_limit_bytes=32 * 1024 * 1024,
)

# pltpu.roll is documented to follow jnp.roll semantics (shift>0 moves contents toward higher
# indices), i.e. a *left* shift by `off` is roll(x, -off).  We probe the convention once at
# runtime (tiny kernel) so a semantics mismatch cannot silently corrupt the convolution.
_ROLL_SHIFT_SIGN = -1  # numpy convention by default


def _detect_roll_convention():
    def kern(x_ref, o_ref):
        o_ref[...] = pltpu.roll(x_ref[...], 1, axis=1)

    x = jnp.arange(8 * 128, dtype=jnp.float32).reshape(8, 128)
    y = pl.pallas_call(kern, out_shape=jax.ShapeDtypeStruct((8, 128), jnp.float32))(x)
    # numpy convention: y[0, 0] == x[0, 127] == 127 ; otherwise y[0, 0] == x[0, 1] == 1
    return -1 if float(y[0, 0]) == 127.0 else 1


def _shift_left(x, off):
    """Return y with y[..., l] = x[..., l + off] (valid for l < size - off; rest is garbage)."""
    if off == 0:
        return x
    p = x.shape[-1]
    shift = (_ROLL_SHIFT_SIGN * off) % p  # positive static shift, equivalent mod p
    return pltpu.roll(x, shift, axis=x.ndim - 1)


# ----------------------------------------------------------------------------
# Kernels (all operate on one image per grid step, channel-major flattened spatial layout)
# ----------------------------------------------------------------------------
def _conv_s1_kernel(x_ref, w_ref, s_ref, t_ref, o_ref, *, k, wp, act):
    """Stride-1 kxk conv:  y = act((sum_taps W_tap @ shift(x)) * scale + shift)."""
    x = x_ref[0].astype(jnp.float32)          # (Cin, P), P = flattened padded spatial
    cout = o_ref.shape[1]
    p = x.shape[-1]
    acc = jnp.zeros((cout, p), jnp.float32)
    for t in range(k * k):
        di, dj = t // k, t % k
        off = di * wp + dj
        acc = acc + jnp.dot(w_ref[t], _shift_left(x, off),
                            preferred_element_type=jnp.float32)
    y = acc * s_ref[...] + t_ref[...]         # BN affine (conv bias folded in)
    if act == "relu":
        y = jnp.maximum(y, 0.0)
    elif act == "sigmoid":
        y = jax.nn.sigmoid(y)
    o_ref[0] = y.astype(o_ref.dtype)


def _resblock_kernel(x_ref, w1_ref, s1_ref, t1_ref, w2_ref, s2_ref, t2_ref, o_ref, *, wp):
    """Fused ResBlock: x + BN2(1x1conv(ReLU(BN1(3x3conv(ReLU(x)))))). Intermediate stays in VMEM."""
    x = x_ref[0].astype(jnp.float32)          # (C, P)
    c = x.shape[0]
    p = x.shape[-1]
    xr = jnp.maximum(x, 0.0)                  # input ReLU, applied once per element
    acc = jnp.zeros((c, p), jnp.float32)
    for t in range(9):                        # 3x3 conv, pad=1 (pre-padded in wrapper)
        di, dj = t // 3, t % 3
        off = di * wp + dj
        acc = acc + jnp.dot(w1_ref[t], _shift_left(xr, off),
                            preferred_element_type=jnp.float32)
    h = acc * s1_ref[...] + t1_ref[...]       # BN1 (bias folded)
    h = jnp.maximum(h, 0.0)                   # ReLU
    y = jnp.dot(w2_ref[...], h, preferred_element_type=jnp.float32)   # 1x1 conv
    y = y * s2_ref[...] + t2_ref[...]         # BN2 (bias folded)
    res = _shift_left(x, wp + 1)              # original x, aligned to the output frame
    o_ref[0] = (y + res).astype(o_ref.dtype)


def _convt_s2_kernel(x_ref, w_ref, s_ref, t_ref, o_ref, *, wp, act):
    """4x4 / stride-2 / pad-1 ConvTranspose2d as 4 sub-pixel 2x2 phase convs (no zero-insertion)."""
    x = x_ref[0].astype(jnp.float32)          # (Cin, P)
    cout = o_ref.shape[2]
    p = x.shape[-1]
    for ph in range(4):                       # phase = ry*2 + rx  ->  output pixel (2i+ry, 2j+rx)
        ry, rx = ph // 2, ph % 2
        acc = jnp.zeros((cout, p), jnp.float32)
        for t in range(4):                    # 2x2 phase kernel
            di, dj = t // 2, t % 2
            off = (ry + di) * wp + (rx + dj)
            acc = acc + jnp.dot(w_ref[ph, t], _shift_left(x, off),
                                preferred_element_type=jnp.float32)
        y = acc * s_ref[...] + t_ref[...]
        if act == "relu":
            y = jnp.maximum(y, 0.0)
        elif act == "sigmoid":
            y = jax.nn.sigmoid(y)
        o_ref[0, ph] = y.astype(o_ref.dtype)


# ----------------------------------------------------------------------------
# JAX glue: padding / flattening, wrappers around pallas_call, weight preprocessing
# ----------------------------------------------------------------------------
def _round_up(x, m):
    return (x + m - 1) // m * m


def _pad_flatten(x_nchw, pad):
    """NCHW -> (N, C, P): zero-pad spatially, flatten rows, add one extra zero row so every
    in-kernel tap shift stays in bounds, and round P up to a multiple of 128 (lane-dense)."""
    n, c, h, w = x_nchw.shape
    hp, wp = h + 2 * pad, w + 2 * pad
    p = _round_up((hp + 1) * wp, 128)
    xp = jnp.pad(x_nchw, ((0, 0), (0, 0), (pad, pad), (pad, pad)))
    xp = xp.reshape(n, c, hp * wp)
    xp = jnp.pad(xp, ((0, 0), (0, 0), (0, p - hp * wp)))
    return xp, hp, wp, p


def conv2d_s1(x, w_taps, scale, shift, *, k, pad, act, out_dtype=_BF16):
    """x: (N,Cin,H,W); w_taps: (k*k, Cout, Cin). Stride-1 conv + BN affine + activation."""
    n, cin, h, w = x.shape
    cout = w_taps.shape[1]
    ho, wo = h + 2 * pad - k + 1, w + 2 * pad - k + 1
    xp, _, wp, p = _pad_flatten(x, pad)
    kern = functools.partial(_conv_s1_kernel, k=k, wp=wp, act=act)
    out = pl.pallas_call(
        kern,
        out_shape=jax.ShapeDtypeStruct((n, cout, p), out_dtype),
        grid_spec=pltpu.PrefetchScalarGridSpec(
            num_scalar_prefetch=0,
            grid=(n,),
            in_specs=[
                pl.BlockSpec((1, cin, p), lambda i: (i, 0, 0)),
                pl.BlockSpec((k * k, cout, cin), lambda i: (0, 0, 0)),
                pl.BlockSpec((cout, 1), lambda i: (0, 0)),
                pl.BlockSpec((cout, 1), lambda i: (0, 0)),
            ],
            out_specs=pl.BlockSpec((1, cout, p), lambda i: (i, 0, 0)),
        ),
        compiler_params=_COMPILER_PARAMS,
        cost_estimate=pl.CostEstimate(
            flops=2 * n * k * k * cin * cout * p,
            transcendentals=0,
            bytes_accessed=n * cin * p * 2 + n * cout * p * jnp.dtype(out_dtype).itemsize
            + k * k * cout * cin * 4,
        ),
    )(xp.astype(_BF16), w_taps.astype(jnp.float32),
      scale.reshape(cout, 1).astype(jnp.float32),
      shift.reshape(cout, 1).astype(jnp.float32))
    return out[:, :, :ho * wp].reshape(n, cout, ho, wp)[:, :, :, :wo]


def resblock(x, rbp):
    """Fused ResBlock; x: (N,C,H,W) -> (N,C,H,W)."""
    n, c, h, w = x.shape
    xp, _, wp, p = _pad_flatten(x, 1)
    kern = functools.partial(_resblock_kernel, wp=wp)
    out = pl.pallas_call(
        kern,
        out_shape=jax.ShapeDtypeStruct((n, c, p), _BF16),
        grid_spec=pltpu.PrefetchScalarGridSpec(
            num_scalar_prefetch=0,
            grid=(n,),
            in_specs=[
                pl.BlockSpec((1, c, p), lambda i: (i, 0, 0)),
                pl.BlockSpec((9, c, c), lambda i: (0, 0, 0)),
                pl.BlockSpec((c, 1), lambda i: (0, 0)),
                pl.BlockSpec((c, 1), lambda i: (0, 0)),
                pl.BlockSpec((c, c), lambda i: (0, 0)),
                pl.BlockSpec((c, 1), lambda i: (0, 0)),
                pl.BlockSpec((c, 1), lambda i: (0, 0)),
            ],
            out_specs=pl.BlockSpec((1, c, p), lambda i: (i, 0, 0)),
        ),
        compiler_params=_COMPILER_PARAMS,
        cost_estimate=pl.CostEstimate(
            flops=2 * n * 10 * c * c * p,
            transcendentals=0,
            bytes_accessed=n * c * p * 4 + (10 * c * c + 4 * c) * 4,
        ),
    )(
        xp.astype(_BF16),
        rbp["w1_taps"].astype(jnp.float32),
        rbp["s1"].reshape(c, 1).astype(jnp.float32),
        rbp["t1"].reshape(c, 1).astype(jnp.float32),
        rbp["w2"].astype(jnp.float32),
        rbp["s2"].reshape(c, 1).astype(jnp.float32),
        rbp["t2"].reshape(c, 1).astype(jnp.float32),
    )
    return out[:, :, :h * wp].reshape(n, c, h, wp)[:, :, :, :w]


def conv_transpose2d_s2(x, w_phase, scale, shift, *, act, out_dtype=_BF16):
    """ConvTranspose2d(k=4, stride=2, pad=1) via 4 sub-pixel 2x2 phase convs + interleave."""
    n, cin, h, w = x.shape
    cout = w_phase.shape[2]
    xp, _, wp, p = _pad_flatten(x, 1)
    kern = functools.partial(_convt_s2_kernel, wp=wp, act=act)
    out = pl.pallas_call(
        kern,
        out_shape=jax.ShapeDtypeStruct((n, 4, cout, p), out_dtype),
        grid_spec=pltpu.PrefetchScalarGridSpec(
            num_scalar_prefetch=0,
            grid=(n,),
            in_specs=[
                pl.BlockSpec((1, cin, p), lambda i: (i, 0, 0)),
                pl.BlockSpec((4, 4, cout, cin), lambda i: (0, 0, 0, 0)),
                pl.BlockSpec((cout, 1), lambda i: (0, 0)),
                pl.BlockSpec((cout, 1), lambda i: (0, 0)),
            ],
            out_specs=pl.BlockSpec((1, 4, cout, p), lambda i: (i, 0, 0, 0)),
        ),
        compiler_params=_COMPILER_PARAMS,
        cost_estimate=pl.CostEstimate(
            flops=2 * n * 16 * cin * cout * p,
            transcendentals=(n * 4 * cout * p) if act == "sigmoid" else 0,
            bytes_accessed=n * cin * p * 2
            + n * 4 * cout * p * jnp.dtype(out_dtype).itemsize + 16 * cout * cin * 4,
        ),
    )(xp.astype(_BF16), w_phase.astype(jnp.float32),
      scale.reshape(cout, 1).astype(jnp.float32),
      shift.reshape(cout, 1).astype(jnp.float32))
    # crop garbage columns, then pixel-shuffle the 4 phase planes
    out = out[:, :, :, :h * wp].reshape(n, 2, 2, cout, h, wp)[:, :, :, :, :, :w]
    out = jnp.transpose(out, (0, 3, 4, 1, 5, 2))          # (N, Cout, H, ry, W, rx)
    return out.reshape(n, cout, 2 * h, 2 * w)


# -------------------- weight preprocessing (tap / phase form) --------------------
def _conv_taps(w_oihw):
    """Conv2d weight (Cout, Cin, k, k) -> (k*k, Cout, Cin), tap index t = di*k + dj."""
    cout, cin, k, _ = w_oihw.shape
    return jnp.transpose(w_oihw, (2, 3, 0, 1)).reshape(k * k, cout, cin)


def _convt_s1_taps(w_iohw):
    """ConvTranspose2d (Cin, Cout, k, k), stride 1  ==  conv with spatially flipped kernel."""
    cin, cout, k, _ = w_iohw.shape
    w_flip = w_iohw[:, :, ::-1, ::-1]
    return jnp.transpose(w_flip, (2, 3, 1, 0)).reshape(k * k, cout, cin)


def _convt_s2_phase_taps(w_iohw):
    """ConvTranspose2d (Cin, Cout, 4, 4), stride 2, pad 1 -> (4 phases, 4 taps, Cout, Cin)."""
    w_klo = jnp.transpose(w_iohw, (2, 3, 1, 0))   # (ki, kj, Cout, Cin)
    phases = []
    for ry in range(2):
        for rx in range(2):
            taps = [w_klo[3 - ry - 2 * di, 3 - rx - 2 * dj]
                    for di in range(2) for dj in range(2)]
            phases.append(jnp.stack(taps))
    return jnp.stack(phases)                       # (4, 4, Cout, Cin)


def bn_fold(gamma, beta, mean, var, eps=1e-5):
    scale = gamma / jnp.sqrt(var + eps)
    shift = beta - mean * scale
    return scale, shift


def fold_bias(bias, scale, shift):
    """Fold the conv bias into the BN affine:  (x + b)*s + t  ==  x*s + (b*s + t)."""
    return scale, shift + bias * scale


# ----------------------------------------------------------------------------
# Parameters (deterministic synthetic init matching the PyTorch module's shapes)
# ----------------------------------------------------------------------------
def init_params(key, dim_z, num_rb):
    def nrm(k, shape, s=0.1):
        return s * jax.random.normal(k, shape, jnp.float32)

    def bn(k, c_):
        k1, k2, k3, k4 = jax.random.split(k, 4)
        gamma = 1.0 + 0.1 * jax.random.normal(k1, (c_,), jnp.float32)
        beta = 0.1 * jax.random.normal(k2, (c_,), jnp.float32)
        mean = 0.1 * jax.random.normal(k3, (c_,), jnp.float32)
        var = 1.0 + 0.1 * jnp.abs(jax.random.normal(k4, (c_,), jnp.float32))
        return bn_fold(gamma, beta, mean, var)

    keys = iter(jax.random.split(key, 64))
    res = []
    for _ in range(num_rb - 1):  # ResBlock: ReLU, Conv3x3, BN, ReLU, Conv1x1, BN; out = x + block(x)
        w1 = nrm(next(keys), (dim_z, dim_z, 3, 3)); b1 = nrm(next(keys), (dim_z,))
        s1, t1 = fold_bias(b1, *bn(next(keys), dim_z))
        w2 = nrm(next(keys), (dim_z, dim_z, 1, 1)); b2 = nrm(next(keys), (dim_z,))
        s2, t2 = fold_bias(b2, *bn(next(keys), dim_z))
        res.append(dict(w1_taps=_conv_taps(w1), s1=s1, t1=t1,
                        w2=w2[:, :, 0, 0], s2=s2, t2=t2))

    w1 = nrm(next(keys), (dim_z, dim_z, 3, 3)); b1 = nrm(next(keys), (dim_z,))
    s1, t1 = fold_bias(b1, *bn(next(keys), dim_z))
    w2 = nrm(next(keys), (dim_z, dim_z // 2, 4, 4)); b2 = nrm(next(keys), (dim_z // 2,))
    s2, t2 = fold_bias(b2, *bn(next(keys), dim_z // 2))
    w3 = nrm(next(keys), (dim_z // 2, dim_z // 4, 4, 4)); b3 = nrm(next(keys), (dim_z // 4,))
    s3, t3 = fold_bias(b3, *bn(next(keys), dim_z // 4))
    w4 = nrm(next(keys), (dim_z // 4, 3, 4, 4)); b4 = nrm(next(keys), (3,))
    s4, t4 = fold_bias(b4, jnp.ones((3,), jnp.float32), jnp.zeros((3,), jnp.float32))  # no BN

    convt = dict(
        w1_taps=_convt_s1_taps(w1), s1=s1, t1=t1,
        w2_phase=_convt_s2_phase_taps(w2), s2=s2, t2=t2,
        w3_phase=_convt_s2_phase_taps(w3), s3=s3, t3=t3,
        w4_phase=_convt_s2_phase_taps(w4), s4=s4, t4=t4,
    )
    return dict(res=res, convt=convt)


# ----------------------------------------------------------------------------
# Full forward (matches DecoderVqResnet256.forward); NCHW in, NCHW out
# ----------------------------------------------------------------------------
def decoder_vq_resnet256_forward(params, z_nchw):
    x = z_nchw
    for rb in params["res"]:                          # self.res : (num_rb - 1) ResBlocks
        x = resblock(x, rb)
    cp = params["convt"]                              # self.convt
    x = conv2d_s1(x, cp["w1_taps"], cp["s1"], cp["t1"], k=3, pad=1, act="relu")
    x = conv_transpose2d_s2(x, cp["w2_phase"], cp["s2"], cp["t2"], act="relu")
    x = conv_transpose2d_s2(x, cp["w3_phase"], cp["s3"], cp["t3"], act="relu")
    x = conv_transpose2d_s2(x, cp["w4_phase"], cp["s4"], cp["t4"], act="sigmoid",
                            out_dtype=jnp.float32)
    return x


# ----------------------------------------------------------------------------
if __name__ == "__main__":
    _ROLL_SHIFT_SIGN = _detect_roll_convention()      # fix pltpu.roll shift sign convention

    key = jax.random.PRNGKey(0)
    k_params, k_z = jax.random.split(key)

    dim_z = 8      # dim_z // 4 = 2
    num_rb = 3     # -> 2 ResBlocks
    N, H, W = 2, 8, 8

    params = init_params(k_params, dim_z, num_rb)
    z = jax.random.normal(k_z, (N, dim_z, H, W), jnp.float32)  # NCHW like PyTorch

    fwd = jax.jit(decoder_vq_resnet256_forward)
    out = jax.block_until_ready(fwd(params, z))

    assert out.shape == (N, 3, 8 * H, 8 * W), out.shape
    assert bool(jnp.all(jnp.isfinite(out)))
    assert bool(jnp.all((out >= 0.0) & (out <= 1.0)))  # sigmoid output range
    print("KERNEL_OK")
</pallas_src>

<mosaic_0001>
module attributes {stable_mosaic.version = 11 : i64} {
  func.func @kern(%arg0: memref<8x128xf32, #tpu.memory_space<vmem>>, %arg1: memref<8x128xf32, #tpu.memory_space<vmem>>) attributes {dimension_semantics = [], scalar_prefetch = 0 : i64, scratch_operands = 0 : i64, tpu.core_type = #tpu.core_type<tc>} {
    %c0 = arith.constant 0 : index
    %c0_0 = arith.constant 0 : index
    %0 = vector.load %arg0[%c0, %c0_0] : memref<8x128xf32, #tpu.memory_space<vmem>>, vector<8x128xf32>
    %c1_i32 = arith.constant 1 : i32
    %1 = tpu.dynamic_rotate %0 by %c1_i32 dim 1 : vector<8x128xf32>, i32 -> vector<8x128xf32>
    %c0_1 = arith.constant 0 : index
    %c0_2 = arith.constant 0 : index
    %2 = vector.load %arg1[%c0_1, %c0_2] : memref<8x128xf32, #tpu.memory_space<vmem>>, vector<8x128xf32>
    tpu.vector_store %arg1[%c0_1, %c0_2], %1 {strides = array<i32>} : memref<8x128xf32, #tpu.memory_space<vmem>>, vector<8x128xf32>,
    return
  }
}

</mosaic_0001>

<bundles_post_ra>
// kernel: tpu_custom_call.1
= control target key start
LH: loop header
LB: loop body
LE: loop exit
PB: predicated region body
PF: predicated region fallthrough
CT: control target
= control target key end

     0   :  { %6 = vsyncpa [#allocation3], 0  ;;  %s106_s0 = inlined_call_operand.hbm [shape: f32[8,128], index: 0, kind: input, shape index: {}]   ;;  %s107_s1 = inlined_call_operand.hbm [shape: f32[8,128], index: 1, kind: output, shape index: {}]  }
   0x1   :  { %7 = vsyncpa [#allocation4], 0  ;;  %s87_s6 = smov [#allocation2]  }
   0x2   :  { %s14_s7 = sshll.u32 %s87_s6, 4  ;;  %s15_s7 = int_to_ptr.vmem [resolvable:$true] %s14_s7 }
   0x3   :  { %s51_s8 = scalar_lea.vmem %s15_s7, 128  ;;  %p56_p1 = scmp.lt.s32.totalorder %s15_s7, %s15_s7 }
   0x4   :  { %p52_p0 = scmp.ne.s32.totalorder %s15_s7, %s51_s8  ;;  %p57_p2 = scmp.lt.s32.totalorder %s51_s8, %s51_s8 }
   0x6   :  { %p58_p3 = por %p57_p2, %p56_p1 }
   0x8   :  { %p59_p4 = pnand %p58_p3, %p52_p0 }
   0xa   :  { %62 = shalt.err (!%p59_p4)
}
   0xb   :  { %17 = dma.hbm_to_vmem [thread:$0]  %s106_s0, 128, %s15_s7, [#allocation3]  }
   0xc   :  { %83 = dma.done.wait [#allocation3], 128  }
   0xd   :  { %84 = vsyncadd [#allocation3], 4294967168  ;;  %v21_v0 = vld [vmem:[#allocation2] sm:$0xff]  ;;  %s88_s11 = smov 1   ;;  %s89_s12 = smov [#allocation5]  }
   0xe   :  { %22 = vrot.lane.b32.xlu0 %v21_v0, %s88_s11  ;;  %s31_s13 = sshll.u32 %s89_s12, 4  ;;  %s32_s13 = int_to_ptr.vmem [resolvable:$true] %s31_s13 }
   0xf   :  { %s63_s14 = scalar_lea.vmem %s32_s13, 128  ;;  %p68_p6 = scmp.lt.s32.totalorder %s32_s13, %s32_s13 }
  0x10   :  { %p64_p5 = scmp.ne.s32.totalorder %s32_s13, %s63_s14  ;;  %p69_p7 = scmp.lt.s32.totalorder %s63_s14, %s63_s14 }
  0x12   :  { %p70_p8 = por %p69_p7, %p68_p6 }
  0x14   :  { %p71_p9 = pnand %p70_p8, %p64_p5 }
  0x80   :  { %v23_v1 = vpop.permute.xlu0 %22 }
  0x81   :  { %24 = vst [vmem:[#allocation5] sm:$0xff] %v23_v1 }
  0x82   :  { %74 = shalt.err (!%p71_p9)
}
  0x83   :  { %34 = dma.vmem_to_hbm [thread:$0]  %s32_s13, 128, %s107_s1, [#allocation4]  }
  0x84   :  { %85 = dma.done.wait [#allocation4], 128  }
  0x85   :  { %86 = vsyncadd [#allocation4], 4294967168 }
  0x86   :  { %38 = vsyncpa [#allocation3], 1 }
  0x87   :  { %39 = vsyncpa [#allocation4], 1 }

</bundles_post_ra>
